<compile_context>
chip_gen: v5e
topology: v5e:2x2
jax: 0.10.0
libtpu: 0.0.40
codegen_flags: <defaults>
</compile_context>

<pallas_src>
import jax
import jax.numpy as jnp
from jax import lax
from jax.experimental import pallas as pl
from jax.experimental.pallas import tpu as pltpu


def _conv_sig_kernel(x_ref, w_ref, o_ref):
    # x_ref: (N, K2C+1, HW)  im2col slab + ones row, lane axis = H*W (dense)
    # w_ref: (Cout, K2C+1)   flattened conv weight with bias column appended
    # o_ref: (N, Cout, HW)   NCHW output with flattened spatial (lane-dense)
    w = w_ref[...]                                   # resident, loaded once
    for n in range(x_ref.shape[0]):                  # static unroll over batch
        acc = jnp.dot(w, x_ref[n],
                      preferred_element_type=jnp.float32)   # (Cout, HW) on MXU
        o_ref[n] = jax.nn.sigmoid(acc).astype(o_ref.dtype)


def basic_block_sig(x_nchw, weight_oihw, bias, *, stride=1, pad=1):
    """Conv2d(ksize, stride=1, pad) + Sigmoid.  (N, Cin, H, W) -> (N, Cout, Ho, Wo)."""
    # TODO(synk): only stride=1 (the module default) is implemented.
    assert stride == 1, "only stride=1 is implemented"
    N, Cin, H, W = x_nchw.shape
    Cout, _, KH, KW = weight_oihw.shape
    Ho = H + 2 * pad - KH + 1
    Wo = W + 2 * pad - KW + 1
    K2C = Cin * KH * KW
    HW = Ho * Wo
    # Lane-dense store requirement: HW is a multiple of 128 here (16*16=256).
    # TODO(synk): if H,W ever change so Ho*Wo % 128 != 0, pad HW up to the next
    # multiple of 128 in the slab/out layout and slice in the wrapper.

    # Wrapper-side layout plumbing: zero-pad + gather the KH*KW shifted views
    # into an im2col slab (N, Cin*KH*KW, Ho*Wo), rows ordered (c, kh, kw) to
    # match weight.reshape(Cout, Cin*KH*KW).  A ones row is appended so the
    # bias folds into the single matmul.
    x_pad = jnp.pad(x_nchw, ((0, 0), (0, 0), (pad, pad), (pad, pad)))
    taps = [x_pad[:, :, kh:kh + Ho, kw:kw + Wo]
            for kh in range(KH) for kw in range(KW)]          # each (N, Cin, Ho, Wo)
    im2col = jnp.stack(taps, axis=2).reshape(N, K2C, HW)
    ones_row = jnp.ones((N, 1, HW), dtype=x_nchw.dtype)
    im2col_aug = jnp.concatenate([im2col, ones_row], axis=1)  # (N, K2C+1, HW)

    w_flat = weight_oihw.reshape(Cout, K2C).astype(x_nchw.dtype)
    w_aug = jnp.concatenate(
        [w_flat, bias.reshape(Cout, 1).astype(x_nchw.dtype)], axis=1)  # (Cout, K2C+1)

    K2C1 = K2C + 1

    out = pl.pallas_call(
        _conv_sig_kernel,
        out_shape=jax.ShapeDtypeStruct((N, Cout, HW), x_nchw.dtype),
        grid=(1,),                                   # single step: no per-step overhead
        in_specs=[
            pl.BlockSpec((N, K2C1, HW), lambda i: (0, 0, 0)),
            pl.BlockSpec((Cout, K2C1), lambda i: (0, 0)),
        ],
        out_specs=pl.BlockSpec((N, Cout, HW), lambda i: (0, 0, 0)),
        compiler_params=pltpu.CompilerParams(
            dimension_semantics=("arbitrary",),
            # Let XLA fuse the pad+stack im2col producer (and the tiny weight
            # concat) directly into the pallas_call operands -- removes the
            # standalone producer dispatch / HBM round trip.
            allow_input_fusion=[True, True],
        ),
    )(im2col_aug, w_aug)

    # Contiguous (free) reshape back to NCHW spatial dims -- no transpose.
    return out.reshape(N, Cout, Ho, Wo)


def _reference(x_nchw, weight_oihw, bias, *, pad=1):
    y = lax.conv_general_dilated(
        x_nchw.astype(jnp.float32), weight_oihw.astype(jnp.float32),
        window_strides=(1, 1), padding=((pad, pad), (pad, pad)),
        dimension_numbers=("NCHW", "OIHW", "NCHW"))
    y = y + bias.reshape(1, -1, 1, 1)
    return jax.nn.sigmoid(y)


if __name__ == "__main__":
    # BasicBlockSig(in_channels=4, out_channels=8, ksize=3, stride=1, pad=1)
    N, Cin, H, W = 2, 4, 16, 16
    Cout, K = 8, 3

    key = jax.random.PRNGKey(0)
    kx, kw, kb = jax.random.split(key, 3)

    x = jax.random.normal(kx, (N, Cin, H, W), dtype=jnp.float32)
    fan_in = Cin * K * K
    bound = 1.0 / (fan_in ** 0.5)
    weight = jax.random.uniform(kw, (Cout, Cin, K, K), dtype=jnp.float32,
                                minval=-bound, maxval=bound)
    bias = jax.random.uniform(kb, (Cout,), dtype=jnp.float32,
                              minval=-bound, maxval=bound)

    out = basic_block_sig(x, weight, bias, pad=1)
    out = jax.block_until_ready(out)

    ref = _reference(x, weight, bias, pad=1)
    assert out.shape == (N, Cout, H, W), out.shape
    assert jnp.allclose(out, ref, atol=1e-5, rtol=1e-5), \
        float(jnp.max(jnp.abs(out - ref)))

    print("KERNEL_OK")
</pallas_src>

<mosaic_0001>
module attributes {stable_mosaic.version = 11 : i64} {
  func.func @_conv_sig_kernel(%arg0: i32, %arg1: memref<2x37x256xf32, #tpu.memory_space<vmem>>, %arg2: memref<8x37xf32, #tpu.memory_space<vmem>>, %arg3: memref<2x8x256xf32, #tpu.memory_space<vmem>>) attributes {dimension_semantics = [#tpu.dimension_semantics<arbitrary>], iteration_bounds = array<i64: 1>, scalar_prefetch = 0 : i64, scratch_operands = 0 : i64, tpu.core_type = #tpu.core_type<tc>, window_params = [{pipeline_mode = #tpu.pipeline_mode<synchronous>, transform_indices = @transform_0, window_bounds = array<i64: 2, 37, 256>}, {pipeline_mode = #tpu.pipeline_mode<synchronous>, transform_indices = @transform_1, window_bounds = array<i64: 8, 37>}, {pipeline_mode = #tpu.pipeline_mode<synchronous>, transform_indices = @transform_2, window_bounds = array<i64: 2, 8, 256>}]} {
    %c0 = arith.constant 0 : index
    %c0_0 = arith.constant 0 : index
    %0 = vector.load %arg2[%c0, %c0_0] : memref<8x37xf32, #tpu.memory_space<vmem>>, vector<8x37xf32>
    %c0_1 = arith.constant 0 : index
    %c0_2 = arith.constant 0 : index
    %c0_3 = arith.constant 0 : index
    %1 = vector.load %arg1[%c0_1, %c0_2, %c0_3] : memref<2x37x256xf32, #tpu.memory_space<vmem>>, vector<1x37x256xf32>
    %2 = vector.shape_cast %1 : vector<1x37x256xf32> to vector<37x256xf32>
    %cst = arith.constant dense<0.000000e+00> : vector<8x256xf32>
    %3 = tpu.matmul %0, %2, %cst {dimension_numbers = #tpu.dot_dimension_numbers<[1], [0], [0], [1], [0, 0, 1, 1], [], []>} : vector<8x37xf32>, vector<37x256xf32>, vector<8x256xf32> -> vector<8x256xf32>
    %4 = arith.negf %3 : vector<8x256xf32>
    %5 = math.exp %4 : vector<8x256xf32>
    %cst_4 = arith.constant 1.000000e+00 : f32
    %6 = vector.broadcast %cst_4 : f32 to vector<8x256xf32>
    %7 = arith.addf %6, %5 : vector<8x256xf32>
    %8 = arith.divf %6, %7 : vector<8x256xf32>
    %c0_5 = arith.constant 0 : index
    %c0_6 = arith.constant 0 : index
    %c0_7 = arith.constant 0 : index
    %9 = vector.load %arg3[%c0_5, %c0_6, %c0_7] : memref<2x8x256xf32, #tpu.memory_space<vmem>>, vector<1x8x256xf32>
    %10 = vector.shape_cast %9 : vector<1x8x256xf32> to vector<8x256xf32>
    %11 = vector.shape_cast %8 : vector<8x256xf32> to vector<1x8x256xf32>
    tpu.vector_store %arg3[%c0_5, %c0_6, %c0_7], %11 {strides = array<i32>} : memref<2x8x256xf32, #tpu.memory_space<vmem>>, vector<1x8x256xf32>,
    %c1 = arith.constant 1 : index
    %c0_8 = arith.constant 0 : index
    %c0_9 = arith.constant 0 : index
    %12 = vector.load %arg1[%c1, %c0_8, %c0_9] : memref<2x37x256xf32, #tpu.memory_space<vmem>>, vector<1x37x256xf32>
    %13 = vector.shape_cast %12 : vector<1x37x256xf32> to vector<37x256xf32>
    %cst_10 = arith.constant dense<0.000000e+00> : vector<8x256xf32>
    %14 = tpu.matmul %0, %13, %cst_10 {dimension_numbers = #tpu.dot_dimension_numbers<[1], [0], [0], [1], [0, 0, 1, 1], [], []>} : vector<8x37xf32>, vector<37x256xf32>, vector<8x256xf32> -> vector<8x256xf32>
    %15 = arith.negf %14 : vector<8x256xf32>
    %16 = math.exp %15 : vector<8x256xf32>
    %cst_11 = arith.constant 1.000000e+00 : f32
    %17 = vector.broadcast %cst_11 : f32 to vector<8x256xf32>
    %18 = arith.addf %17, %16 : vector<8x256xf32>
    %19 = arith.divf %17, %18 : vector<8x256xf32>
    %c1_12 = arith.constant 1 : index
    %c0_13 = arith.constant 0 : index
    %c0_14 = arith.constant 0 : index
    %20 = vector.load %arg3[%c1_12, %c0_13, %c0_14] : memref<2x8x256xf32, #tpu.memory_space<vmem>>, vector<1x8x256xf32>
    %21 = vector.shape_cast %20 : vector<1x8x256xf32> to vector<8x256xf32>
    %22 = vector.shape_cast %19 : vector<8x256xf32> to vector<1x8x256xf32>
    tpu.vector_store %arg3[%c1_12, %c0_13, %c0_14], %22 {strides = array<i32>} : memref<2x8x256xf32, #tpu.memory_space<vmem>>, vector<1x8x256xf32>,
    return
  }
  func.func @transform_0(%arg0: i32) -> (i32, i32, i32) {
    %c0_i32 = arith.constant 0 : i32
    %c0_i32_0 = arith.constant 0 : i32
    %c0_i32_1 = arith.constant 0 : i32
    %c0_i32_2 = arith.constant 0 : i32
    return %c0_i32, %c0_i32_0, %c0_i32_1 : i32, i32, i32
  }
  func.func @transform_1(%arg0: i32) -> (i32, i32) {
    %c0_i32 = arith.constant 0 : i32
    %c0_i32_0 = arith.constant 0 : i32
    %c0_i32_1 = arith.constant 0 : i32
    return %c0_i32, %c0_i32_0 : i32, i32
  }
  func.func @transform_2(%arg0: i32) -> (i32, i32, i32) {
    %c0_i32 = arith.constant 0 : i32
    %c0_i32_0 = arith.constant 0 : i32
    %c0_i32_1 = arith.constant 0 : i32
    %c0_i32_2 = arith.constant 0 : i32
    return %c0_i32, %c0_i32_0, %c0_i32_1 : i32, i32, i32
  }
}

</mosaic_0001>

<bundles_post_ra>
// kernel: tpu_custom_call.1
= control target key start
LH: loop header
LB: loop body
LE: loop exit
PB: predicated region body
PF: predicated region fallthrough
CT: control target
= control target key end

     0   :  { %vm27_vm0 = vcmask 1044480   ;;  %s388_s0 = inlined_call_operand.vmem [shape: f32[2,37,256], index: 0, kind: input, shape index: {}]   ;;  %s389_s1 = inlined_call_operand.vmem [shape: f32[8,37], index: 1, kind: input, shape index: {}]   ;;  %s390_s2 = inlined_call_operand.hbm [shape: f32[2,8,256], index: 2, kind: output, shape index: {}]  }
   0x1   :  { %v21_v0 = vld [vmem:[%s388_s0 + $0x40] sm:$0x1f]  ;;  %v22_v1 = vld [vmem:[%s388_s0 + $0x48] sm:$0x1f]  ;;  %v19_v2 = vld [vmem:[%s388_s0 + $0x30] sm:$0xff] }
   0x2   :  { %230 = vmatpush.msk.msra.mxu0 %vm27_vm0, %v21_v0  ;;  %232 = vmatpush.msk.msra.mxu1 %vm27_vm0, %v22_v1  ;;  %v244_v3 = vld [vmem:[%s388_s0 + $0x90] sm:$0x1f]  ;;  %v245_v4 = vld [vmem:[%s388_s0 + $0x98] sm:$0x1f]  ;;  %v242_v6 = vld [vmem:[%s388_s0 + $0x80] sm:$0xff] }
   0x3   :  { %v20_v5 = vld [vmem:[%s388_s0 + $0x38] sm:$0xff]  ;;  %246 = vmatpush.msk.msra.mxu2 %vm27_vm0, %v244_v3  ;;  %248 = vmatpush.msk.msra.mxu3 %vm27_vm0, %v245_v4  ;;  %v243_v7 = vld [vmem:[%s388_s0 + $0x88] sm:$0xff]  ;;  %v17_v8 = vld [vmem:[%s388_s0 + $0x20] sm:$0xff] }
   0x4   :  { %46 = vmatpush.msra.mxu0 %v19_v2  ;;  %66 = vmatpush.msra.mxu1 %v20_v5  ;;  %v18_v9 = vld [vmem:[%s388_s0 + $0x28] sm:$0xff]  ;;  %v240_v10 = vld [vmem:[%s388_s0 + $0x70] sm:$0xff]  ;;  %v241_v11 = vld [vmem:[%s388_s0 + $0x78] sm:$0xff] }
   0x5   :  { %143 = vmatpush.msra.mxu2 %v242_v6  ;;  %163 = vmatpush.msra.mxu3 %v243_v7  ;;  %v15_v12 = vld [vmem:[%s388_s0 + $0x10] sm:$0xff]  ;;  %v16_v13 = vld [vmem:[%s388_s0 + $0x18] sm:$0xff]  ;;  %v238_v14 = vld [vmem:[%s388_s0 + $0x60] sm:$0xff] }
   0x6   :  { %47 = vmatpush.msra.mxu0 %v17_v8  ;;  %67 = vmatpush.msra.mxu1 %v18_v9  ;;  %v239_v15 = vld [vmem:[%s388_s0 + $0x68] sm:$0xff]  ;;  %v13_v16 = vld [vmem:[%s388_s0] sm:$0xff]  ;;  %v236_v18 = vld [vmem:[%s388_s0 + $0x50] sm:$0xff] }
   0x7   :  { %144 = vmatpush.msra.mxu2 %v240_v10  ;;  %164 = vmatpush.msra.mxu3 %v241_v11  ;;  %v14_v17 = vld [vmem:[%s388_s0 + $0x8] sm:$0xff]  ;;  %v237_v19 = vld [vmem:[%s388_s0 + $0x58] sm:$0xff] }
   0x8   :  { %48 = vmatpush.msra.mxu0 %v15_v12  ;;  %68 = vmatpush.msra.mxu1 %v16_v13 }
   0x9   :  { %7 = vsyncpa [#allocation3], 0  ;;  %145 = vmatpush.msra.mxu2 %v238_v14  ;;  %165 = vmatpush.msra.mxu3 %v239_v15  ;;  %v12_v20 = vld [vmem:[%s389_s1] sm:$0xff]  ;;  %vm23_vm1 = vcmask 302080   ;;  %s297_s0 = smov [#allocation2]   ;;  %s218_s25 = sshll.u32 %s390_s2, 4  ;;  %s219_s25 = int_to_ptr.hbm [resolvable:$true] %s218_s25 }
   0xa   :  { %49 = vmatpush.msra.mxu0 %v13_v16  ;;  %69 = vmatpush.msra.mxu1 %v14_v17  ;;  %s216_s1 = sshll.u32 %s297_s0, 4  ;;  %s298_s26 = smov 256   ;;  %s217_s1 = int_to_ptr.vmem [resolvable:$true] %s216_s1 }
   0xb   :  { %146 = vmatpush.msra.mxu2 %v236_v18  ;;  %166 = vmatpush.msra.mxu3 %v237_v19  ;;  %s299_s27 = smov 16  }
   0xc   :  { %231 = vmatmul.msk.f32.vlgmr.msra.gmra.mxu0 %vm23_vm1, %v12_v20  ;;  %233 = vmatmul.msk.f32.vlgmr.msra.gmra.mxu1 %vm23_vm1, %v12_v20 }
   0xd   :  { %247 = vmatmul.msk.f32.vlgmr.msra.gmra.mxu2 %vm23_vm1, %v12_v20  ;;  %249 = vmatmul.msk.f32.vlgmr.msra.gmra.mxu3 %vm23_vm1, %v12_v20 }
  0x89   :  { %v51_v21 = vpop.f32.mrf.mxu0  ;;  %v71_v22 = vpop.f32.mrf.mxu1 }
  0x8a   :  { %v234_v23 = vmul.f32 -1.442695, %v51_v21  ;;  %v235_v24 = vmul.f32 -1.442695, %v71_v22 }
  0x8c   :  { %255 = vpow2.f32 %v234_v23 }
  0x8d   :  { %257 = vpow2.f32 %v235_v24 }
  0x90   :  { %v148_v25 = vpop.f32.mrf.mxu2  ;;  %v168_v26 = vpop.f32.mrf.mxu3 }
  0x91   :  { %v250_v27 = vmul.f32 -1.442695, %v148_v25  ;;  %v251_v28 = vmul.f32 -1.442695, %v168_v26 }
  0x92   :  { %v256_v29 = vpop.eup %255 }
  0x93   :  { %v258_v30 = vpop.eup %257  ;;  %v80_v31 = vadd.f32 1.0, %v256_v29  ;;  %259 = vpow2.f32 %v250_v27 }
  0x94   :  { %v81_v32 = vadd.f32 1.0, %v258_v30  ;;  %261 = vpow2.f32 %v251_v28 }
  0x95   :  { %263 = vrcp.f32 %v80_v31  ;;  %vm87_vm2 = vweird.f32 %v80_v31  ;;  %v91_v42 = vand.u32 2147483647, %v80_v31  ;;  %v93_v43 = vand.u32 2147483648, %v80_v31 }
  0x96   :  { %265 = vrcp.f32 %v81_v32  ;;  %v106_v46 = vand.u32 2147483647, %v81_v32  ;;  %v108_v47 = vand.u32 2147483648, %v81_v32  ;;  %vm102_vm4 = vweird.f32 %v81_v32 }
  0x97   :  { %v94_v51 = vor.u32 1.1754944e-38, %v93_v43  ;;  %vm92_vm7 = vcmp.eq.f32.partialorder %v91_v42, 8.507059e+37 }
  0x98   :  { %vm107_vm9 = vcmp.eq.f32.partialorder %v106_v46, 8.507059e+37  ;;  %v109_v56 = vor.u32 1.1754944e-38, %v108_v47 }
  0x99   :  { %v260_v33 = vpop.eup %259 }
  0x9a   :  { %v262_v34 = vpop.eup %261  ;;  %v177_v35 = vadd.f32 1.0, %v260_v33 }
  0x9b   :  { %v264_v36 = vpop.eup %263  ;;  %v378_v37 = vadd.f32 1.0, %v262_v34 }
  0x9c   :  { %v266_v38 = vpop.eup %265  ;;  %v83_v39 = vmul.f32 %v264_v36, %v80_v31  ;;  %267 = vrcp.f32 %v177_v35  ;;  %vm88_vm3 = vweird.f32 %v264_v36  ;;  %v190_v62 = vand.u32 2147483648, %v177_v35 }
  0x9d   :  { %v98_v40 = vmul.f32 %v266_v38, %v81_v32  ;;  %269 = vrcp.f32 %v378_v37  ;;  %vm103_vm5 = vweird.f32 %v266_v38  ;;  %vm89_vm6 = vmor %vm87_vm2, %vm88_vm3  ;;  %v188_v0 = vand.u32 2147483647, %v177_v35 }
  0x9e   :  { %v84_v41 = vsub.f32 1.0, %v83_v39  ;;  %vm104_vm8 = vmor %vm102_vm4, %vm103_vm5  ;;  %vm184_vm11 = vweird.f32 %v177_v35  ;;  %v205_v2 = vand.u32 2147483648, %v378_v37  ;;  %v203_v5 = vand.u32 2147483647, %v378_v37 }
  0x9f   :  { %v99_v44 = vsub.f32 1.0, %v98_v40  ;;  %v191_v6 = vor.u32 1.1754944e-38, %v190_v62  ;;  %vm189_vm14 = vcmp.eq.f32.partialorder %v188_v0, 8.507059e+37  ;;  %vm199_vm15 = vweird.f32 %v378_v37 }
  0xa0   :  { %v85_v45 = vmul.f32 %v264_v36, %v84_v41  ;;  %v206_v10 = vor.u32 1.1754944e-38, %v205_v2  ;;  %vm204_vm1 = vcmp.eq.f32.partialorder %v203_v5, 8.507059e+37 }
  0xa1   :  { %v100_v48 = vmul.f32 %v266_v38, %v99_v44 }
  0xa2   :  { %v268_v49 = vpop.eup %267  ;;  %v86_v50 = vadd.f32 %v264_v36, %v85_v45 }
  0xa3   :  { %v101_v52 = vadd.f32 %v266_v38, %v100_v48  ;;  %v180_v53 = vmul.f32 %v268_v49, %v177_v35  ;;  %v270_v54 = vpop.eup %269  ;;  %vm185_vm10 = vweird.f32 %v268_v49 }
  0xa4   :  { %v90_v55 = vsel %vm89_vm6, %v264_v36, %v86_v50  ;;  %v195_v60 = vmul.f32 %v270_v54, %v378_v37  ;;  %vm200_vm12 = vweird.f32 %v270_v54  ;;  %vm186_vm13 = vmor %vm184_vm11, %vm185_vm10 }
  0xa5   :  { %v95_v57 = vsel %vm92_vm7, %v94_v51, %v90_v55  ;;  %v105_v58 = vsel %vm104_vm8, %v266_v38, %v101_v52  ;;  %v181_v59 = vsub.f32 1.0, %v180_v53  ;;  %vm201_vm0 = vmor %vm199_vm15, %vm200_vm12 }
  0xa6   :  { %112 = vst [vmem:[#allocation2] sm:$0xff] %v95_v57  ;;  %v110_v61 = vsel %vm107_vm9, %v109_v56, %v105_v58  ;;  %v196_v1 = vsub.f32 1.0, %v195_v60 }
  0xa7   :  { %113 = vst [vmem:[#allocation2 + $0x8] sm:$0xff] %v110_v61  ;;  %v182_v63 = vmul.f32 %v268_v49, %v181_v59 }
  0xa8   :  { %v197_v4 = vmul.f32 %v270_v54, %v196_v1 }
  0xa9   :  { %v183_v3 = vadd.f32 %v268_v49, %v182_v63 }
  0xaa   :  { %v198_v8 = vadd.f32 %v270_v54, %v197_v4 }
  0xab   :  { %v187_v7 = vsel %vm186_vm13, %v268_v49, %v183_v3 }
  0xac   :  { %v192_v9 = vsel %vm189_vm14, %v191_v6, %v187_v7  ;;  %v202_v11 = vsel %vm201_vm0, %v270_v54, %v198_v8 }
  0xad   :  { %210 = vst [vmem:[#allocation2 + $0x10] sm:$0xff] %v192_v9  ;;  %v207_v12 = vsel %vm204_vm1, %v206_v10, %v202_v11 }
  0xae   :  { %211 = vst [vmem:[#allocation2 + $0x18] sm:$0xff] %v207_v12 }
  0xaf   :  { %224 = dma.vmem_to_hbm [thread:$0]  %s217_s1, 512, %s219_s25, [#allocation3], %s298_s26, %s298_s26, %s299_s27  }
  0xb0   :  { %295 = dma.done.wait [#allocation3], 512  }
  0xb1   :  { %296 = vsyncadd [#allocation3], 4294966784 }
  0xb2   :  { %229 = vsyncpa [#allocation3], 1 }

</bundles_post_ra>
